<compile_context>
chip_gen: v7x
topology: tpu7x:2x2x1
jax: 0.10.0
libtpu: 0.0.40
codegen_flags: <defaults>
</compile_context>

<pallas_src>
import functools

import jax
import jax.numpy as jnp
from jax.experimental import pallas as pl
from jax.experimental.pallas import tpu as pltpu


def _linear_bias_kernel(x_ref, w_ref, b_ref, o_ref, acc_ref):
    k = pl.program_id(2)

    @pl.when(k == 0)
    def _():
        acc_ref[...] = jnp.zeros_like(acc_ref)

    acc_ref[...] += jnp.dot(
        x_ref[...], w_ref[...], preferred_element_type=jnp.float32
    )

    @pl.when(k == pl.num_programs(2) - 1)
    def _():
        # Bias added exactly once, outside the hot K loop.
        o_ref[...] = (acc_ref[...] + b_ref[...]).astype(o_ref.dtype)


def _linear_kernel(x_ref, w_ref, o_ref, acc_ref):
    k = pl.program_id(2)

    @pl.when(k == 0)
    def _():
        acc_ref[...] = jnp.zeros_like(acc_ref)

    acc_ref[...] += jnp.dot(
        x_ref[...], w_ref[...], preferred_element_type=jnp.float32
    )

    @pl.when(k == pl.num_programs(2) - 1)
    def _():
        o_ref[...] = acc_ref[...].astype(o_ref.dtype)


def _round_up(v, m):
    return ((v + m - 1) // m) * m


@functools.partial(
    jax.jit, static_argnames=("tm", "tn", "tk", "compute_dtype")
)
def linear_forward(x, weights, bias=None, *, tm=256, tn=256, tk=512,
                   compute_dtype=jnp.bfloat16):
    """Pallas equivalent of `x @ weights + bias`.

    x:       (batch, fan_in)   float32
    weights: (fan_in, fan_out) float32
    bias:    (fan_out,)        float32 or None
    """
    batch, fan_in = x.shape
    fan_in_w, fan_out = weights.shape
    assert fan_in == fan_in_w
    out_dtype = x.dtype

    # Clamp tiles to the (128/8-aligned) problem size so small shapes use one
    # grid step without over-padding; keep lane dims multiples of 128 and the
    # sublane dim a multiple of 8 for dense (unmasked) loads/stores.
    tm = min(tm, _round_up(batch, 8))
    tn = min(tn, _round_up(fan_out, 128))
    tk = min(tk, _round_up(fan_in, 128))

    mp = _round_up(batch, tm)
    kp = _round_up(fan_in, tk)
    np_ = _round_up(fan_out, tn)

    # bf16 operands for the MXU (f32 accumulation inside the kernel).
    xp = x.astype(compute_dtype)
    wp = weights.astype(compute_dtype)
    if (mp, kp) != (batch, fan_in):
        xp = jnp.pad(xp, ((0, mp - batch), (0, kp - fan_in)))
    if (kp, np_) != (fan_in, fan_out):
        wp = jnp.pad(wp, ((0, kp - fan_in), (0, np_ - fan_out)))

    grid = (mp // tm, np_ // tn, kp // tk)

    x_spec = pl.BlockSpec((tm, tk), lambda i, j, k: (i, k))
    w_spec = pl.BlockSpec((tk, tn), lambda i, j, k: (k, j))
    o_spec = pl.BlockSpec((tm, tn), lambda i, j, k: (i, j))

    out_shape = jax.ShapeDtypeStruct((mp, np_), out_dtype)
    scratch = [pltpu.VMEM((tm, tn), jnp.float32)]
    cparams = pltpu.CompilerParams(
        dimension_semantics=("parallel", "parallel", "arbitrary")
    )

    if bias is not None:
        bp = bias.astype(jnp.float32)
        if np_ != fan_out:
            bp = jnp.pad(bp, ((0, np_ - fan_out),))
        bp = bp.reshape(1, np_)
        b_spec = pl.BlockSpec((1, tn), lambda i, j, k: (0, j))

        out_padded = pl.pallas_call(
            _linear_bias_kernel,
            out_shape=out_shape,
            grid_spec=pltpu.PrefetchScalarGridSpec(
                num_scalar_prefetch=0,
                grid=grid,
                in_specs=[x_spec, w_spec, b_spec],
                out_specs=o_spec,
                scratch_shapes=scratch,
            ),
            compiler_params=cparams,
        )(xp, wp, bp)
    else:
        out_padded = pl.pallas_call(
            _linear_kernel,
            out_shape=out_shape,
            grid_spec=pltpu.PrefetchScalarGridSpec(
                num_scalar_prefetch=0,
                grid=grid,
                in_specs=[x_spec, w_spec],
                out_specs=o_spec,
                scratch_shapes=scratch,
            ),
            compiler_params=cparams,
        )(xp, wp)

    return out_padded[:batch, :fan_out]


if __name__ == "__main__":
    key = jax.random.PRNGKey(0)
    k_x, k_w = jax.random.split(key)

    # Small demo shape consistent with the module (note: at this size the
    # MXU is mostly idle and XLA fusion would be fine; the kernel pays off at
    # realistic fan_in/fan_out in the hundreds+).
    batch, fan_in, fan_out = 8, 32, 64

    # Deterministic parameter init mirroring the module's __init__:
    #   weights = U[0,1) / sqrt(fan_in), bias = ones(fan_out)
    weights = (jax.random.uniform(k_w, (fan_in, fan_out), dtype=jnp.float32)
               / jnp.sqrt(jnp.float32(fan_in)))
    bias = jnp.ones((fan_out,), dtype=jnp.float32)

    x = jax.random.normal(k_x, (batch, fan_in), dtype=jnp.float32)

    # With bias.
    out = jax.block_until_ready(linear_forward(x, weights, bias))
    ref = x @ weights + bias
    assert out.shape == (batch, fan_out)
    # bf16 operands -> loosened tolerance vs f32 reference.
    assert jnp.allclose(out, ref, atol=2e-2, rtol=2e-2), \
        float(jnp.max(jnp.abs(out - ref)))

    # Without bias (use_bias=False path of the module).
    out_nb = jax.block_until_ready(linear_forward(x, weights, None))
    ref_nb = x @ weights
    assert jnp.allclose(out_nb, ref_nb, atol=2e-2, rtol=2e-2), \
        float(jnp.max(jnp.abs(out_nb - ref_nb)))

    print("KERNEL_OK")
</pallas_src>

<mosaic_0001>
module attributes {stable_mosaic.version = 11 : i64} {
  func.func @_linear_bias_kernel(%arg0: i32, %arg1: i32, %arg2: i32, %arg3: memref<8x128xbf16, #tpu.memory_space<vmem>>, %arg4: memref<128x128xbf16, #tpu.memory_space<vmem>>, %arg5: memref<1x128xf32, #tpu.memory_space<vmem>>, %arg6: memref<8x128xf32, #tpu.memory_space<vmem>>, %arg7: memref<8x128xf32, #tpu.memory_space<vmem>>) attributes {dimension_semantics = [#tpu.dimension_semantics<parallel>, #tpu.dimension_semantics<parallel>, #tpu.dimension_semantics<arbitrary>], iteration_bounds = array<i64: 1, 1, 1>, scalar_prefetch = 0 : i64, scratch_operands = 1 : i64, tpu.core_type = #tpu.core_type<tc>, window_params = [{transform_indices = @transform_0, window_bounds = array<i64: 8, 128>}, {transform_indices = @transform_1, window_bounds = array<i64: 128, 128>}, {transform_indices = @transform_2, window_bounds = array<i64: 1, 128>}, {transform_indices = @transform_3, window_bounds = array<i64: 8, 128>}]} {
    %c0_i32 = arith.constant 0 : i32
    %0 = arith.cmpi eq, %arg2, %c0_i32 : i32
    %1 = arith.extui %0 : i1 to i32
    %c0_i32_0 = arith.constant 0 : i32
    %2 = arith.cmpi ne, %1, %c0_i32_0 : i32
    scf.if %2 {
      %cst_10 = arith.constant 0.000000e+00 : f32
      %12 = vector.broadcast %cst_10 : f32 to vector<8x128xf32>
      %c0_11 = arith.constant 0 : index
      %c0_12 = arith.constant 0 : index
      %13 = vector.load %arg7[%c0_11, %c0_12] : memref<8x128xf32, #tpu.memory_space<vmem>>, vector<8x128xf32>
      tpu.vector_store %arg7[%c0_11, %c0_12], %12 {strides = array<i32>} : memref<8x128xf32, #tpu.memory_space<vmem>>, vector<8x128xf32>,
    } else {
    }
    %c0 = arith.constant 0 : index
    %c0_1 = arith.constant 0 : index
    %3 = vector.load %arg7[%c0, %c0_1] : memref<8x128xf32, #tpu.memory_space<vmem>>, vector<8x128xf32>
    %c0_2 = arith.constant 0 : index
    %c0_3 = arith.constant 0 : index
    %4 = vector.load %arg3[%c0_2, %c0_3] : memref<8x128xbf16, #tpu.memory_space<vmem>>, vector<8x128xbf16>
    %c0_4 = arith.constant 0 : index
    %c0_5 = arith.constant 0 : index
    %5 = vector.load %arg4[%c0_4, %c0_5] : memref<128x128xbf16, #tpu.memory_space<vmem>>, vector<128x128xbf16>
    %cst = arith.constant dense<0.000000e+00> : vector<8x128xf32>
    %6 = tpu.matmul %4, %5, %cst {dimension_numbers = #tpu.dot_dimension_numbers<[1], [0], [0], [1], [0, 0, 1, 1], [], []>} : vector<8x128xbf16>, vector<128x128xbf16>, vector<8x128xf32> -> vector<8x128xf32>
    %7 = arith.addf %3, %6 : vector<8x128xf32>
    %c0_6 = arith.constant 0 : index
    %c0_7 = arith.constant 0 : index
    %8 = vector.load %arg7[%c0_6, %c0_7] : memref<8x128xf32, #tpu.memory_space<vmem>>, vector<8x128xf32>
    tpu.vector_store %arg7[%c0_6, %c0_7], %7 {strides = array<i32>} : memref<8x128xf32, #tpu.memory_space<vmem>>, vector<8x128xf32>,
    %c0_i32_8 = arith.constant 0 : i32
    %9 = arith.cmpi eq, %arg2, %c0_i32_8 : i32
    %10 = arith.extui %9 : i1 to i32
    %c0_i32_9 = arith.constant 0 : i32
    %11 = arith.cmpi ne, %10, %c0_i32_9 : i32
    scf.if %11 {
      %c0_10 = arith.constant 0 : index
      %c0_11 = arith.constant 0 : index
      %12 = vector.load %arg7[%c0_10, %c0_11] : memref<8x128xf32, #tpu.memory_space<vmem>>, vector<8x128xf32>
      %c0_12 = arith.constant 0 : index
      %c0_13 = arith.constant 0 : index
      %13 = vector.load %arg5[%c0_12, %c0_13] : memref<1x128xf32, #tpu.memory_space<vmem>>, vector<1x128xf32>
      %14 = vector.broadcast %13 : vector<1x128xf32> to vector<8x128xf32>
      %15 = arith.addf %12, %14 : vector<8x128xf32>
      %c0_14 = arith.constant 0 : index
      %c0_15 = arith.constant 0 : index
      %16 = vector.load %arg6[%c0_14, %c0_15] : memref<8x128xf32, #tpu.memory_space<vmem>>, vector<8x128xf32>
      tpu.vector_store %arg6[%c0_14, %c0_15], %15 {strides = array<i32>} : memref<8x128xf32, #tpu.memory_space<vmem>>, vector<8x128xf32>,
    } else {
    }
    return
  }
  func.func @transform_0(%arg0: i32, %arg1: i32, %arg2: i32) -> (i32, i32) {
    %c0_i32 = arith.constant 0 : i32
    return %arg0, %arg2 : i32, i32
  }
  func.func @transform_1(%arg0: i32, %arg1: i32, %arg2: i32) -> (i32, i32) {
    %c0_i32 = arith.constant 0 : i32
    return %arg2, %arg1 : i32, i32
  }
  func.func @transform_2(%arg0: i32, %arg1: i32, %arg2: i32) -> (i32, i32) {
    %c0_i32 = arith.constant 0 : i32
    %c0_i32_0 = arith.constant 0 : i32
    return %c0_i32, %arg1 : i32, i32
  }
  func.func @transform_3(%arg0: i32, %arg1: i32, %arg2: i32) -> (i32, i32) {
    %c0_i32 = arith.constant 0 : i32
    return %arg0, %arg1 : i32, i32
  }
}

</mosaic_0001>

<bundles_post_ra>
// kernel: linear_forward.1
= control target key start
LH: loop header
LB: loop body
LE: loop exit
PB: predicated region body
PF: predicated region fallthrough
CT: control target
= control target key end

     0   :  { %v229_v1 = vmov 0.0   ;;  %vm230_vm0 = vmmov 0   ;;  %s294_s0 = inlined_call_operand.vmem [shape: bf16[8,128], index: 0, kind: input, shape index: {}]   ;;  %s295_s1 = inlined_call_operand.vmem [shape: bf16[128,128], index: 1, kind: input, shape index: {}]   ;;  %s296_s2 = inlined_call_operand.vmem [shape: f32[1,128], index: 2, kind: input, shape index: {}]   ;;  %s297_s3 = inlined_call_operand.hbm [shape: f32[8,128], index: 3, kind: output, shape index: {}]  }
   0x1   :  { %v197_v0 = vld [vmem:[%s295_s1] sm:$0xff]   ;;  %174 = vmatprep.subr.bf16.mxu0 %v229_v1  ;;  %v198_v2 = vld [vmem:[%s295_s1 + $0x8] sm:$0xff]   ;;  %190 = vmatprep.mubr.msk.bf16.mxu0 %vm230_vm0, %v229_v1  ;;  %v199_v3 = vld [vmem:[%s295_s1 + $0x10] sm:$0xff]  }
   0x2   :  { %175 = vmatpush3.bf16.msra.mxu0 %v197_v0 }
   0x3   :  { %176 = vmatprep.subr.bf16.mxu0 %v229_v1 }
   0x6   :  { %177 = vmatpush3.bf16.msra.mxu0 %v198_v2 }
   0x7   :  { %178 = vmatprep.subr.bf16.mxu0 %v229_v1 }
   0x8   :  { %8 = vsyncpa [#allocation4], 0  ;;  %v200_v4 = vld [vmem:[%s295_s1 + $0x18] sm:$0xff]   ;;  %v201_v5 = vld [vmem:[%s295_s1 + $0x20] sm:$0xff]   ;;  %s231_s5 = smov [#allocation3]  }
   0x9   :  { %v202_v6 = vld [vmem:[%s295_s1 + $0x28] sm:$0xff]   ;;  %v203_v7 = vld [vmem:[%s295_s1 + $0x30] sm:$0xff]   ;;  %v204_v8 = vld [vmem:[%s295_s1 + $0x38] sm:$0xff]   ;;  %s148_s6 = sshll.u32 %s231_s5, 4  ;;  %s149_s6 = int_to_ptr.vmem [resolvable:$true] %s148_s6 }
   0xa   :  { %179 = vmatpush3.bf16.msra.mxu0 %v199_v3  ;;  %v22_v9 = vld [vmem:[%s294_s0] sm:$0xf]  ;;  %s205_s1 = scalar_lea.vmem %s149_s6, 128  ;;  %p210_p1 = scmp.lt.s32.totalorder %s149_s6, %s149_s6 }
   0xb   :  { %180 = vmatprep.subr.bf16.mxu0 %v229_v1  ;;  %v164_v10 = vld [vmem:[%s296_s2] ss:$0 sm:$0xff]  ;;  %p206_p0 = scmp.ne.s32.totalorder %s149_s6, %s205_s1  ;;  %p211_p2 = scmp.lt.s32.totalorder %s205_s1, %s205_s1 }
   0xd   :  { %p212_p3 = por %p211_p2, %p210_p1 }
   0xe   :  { %181 = vmatpush3.bf16.msra.mxu0 %v200_v4 }
   0xf   :  { %182 = vmatprep.subr.bf16.mxu0 %v229_v1  ;;  %p213_p4 = pnand %p212_p3, %p206_p0 }
  0x12   :  { %183 = vmatpush3.bf16.msra.mxu0 %v201_v5 }
  0x13   :  { %184 = vmatprep.subr.bf16.mxu0 %v229_v1 }
  0x16   :  { %185 = vmatpush3.bf16.msra.mxu0 %v202_v6 }
  0x17   :  { %186 = vmatprep.subr.bf16.mxu0 %v229_v1 }
  0x1a   :  { %187 = vmatpush3.bf16.msra.mxu0 %v203_v7 }
  0x1b   :  { %188 = vmatprep.subr.bf16.mxu0 %v229_v1 }
  0x1e   :  { %189 = vmatpush3.bf16.msra.mxu0 %v204_v8 }
  0x21   :  { %191 = vmatmul.mubr.bf16.vlgmr.msra.gmra.mrb[0].mxu0 %v22_v9 }
  0xf4   :  { %v121_v11 = vpop.f32.mrb[0].mxu0 }
  0xf5   :  { %v140_v12 = vadd.f32 %v164_v10, %v121_v11  ;;  %v192_v13 = vpop.f32.mrb[1].mxu0 }
  0xf6   :  { %v124_v14 = vpop.f32.mrb[2].mxu0 }
  0xf7   :  { %141 = vst [vmem:[#allocation3] sm:$0xff] %v140_v12  ;;  %v193_v15 = vpop.f32.mrb[3].mxu0 }
  0xf8   :  { %216 = shalt.err (!%p213_p4)
}
  0xf9   :  { %s217_s2 = scalar_lea.hbm %s297_s3, 128 }
  0xfa   :  { %p218_p5 = scmp.ne.s32.totalorder %s297_s3, %s217_s2  ;;  %p221_p6 = scmp.lt.u32.totalorder %s217_s2, %s297_s3 }
  0xfc   :  { %p223_p7 = pnand %p221_p6, %p218_p5 }
  0xfe   :  { %226 = shalt.err (!%p223_p7)
}
  0xff   :  { %151 = dma.vmem_to_hbm [thread:$0]  %s149_s6, 128, %s297_s3, [#allocation4]  }
 0x100   :  { %227 = dma.done.wait [#allocation4], 128  }
 0x101   :  { %228 = vsyncadd [#allocation4], 4294967168 }
 0x102   :  { %155 = vsyncpa [#allocation4], 1 }

</bundles_post_ra>
